<compile_context>
chip_gen: v5e
topology: v5e:2x2
jax: 0.10.0
libtpu: 0.0.40
codegen_flags: <defaults>
</compile_context>

<pallas_src>
import math

import jax
import jax.numpy as jnp
from jax.experimental import pallas as pl
from jax.experimental.pallas import tpu as pltpu


# ----------------------------------------------------------------------------
# Kernels
# ----------------------------------------------------------------------------
def _single_dma_kernel(x_ref, o_ref, sem):
    # Whole-array HBM -> HBM DMA: streams at full HBM bandwidth, no VMEM
    # round-trip, no vreg traffic, no VMEM capacity pressure (matters most on
    # v7x's 64 MiB VMEM and sidesteps v5e's single-vst-slot ceiling).
    cp = pltpu.make_async_copy(x_ref, o_ref, sem)
    cp.start()
    cp.wait()


def _make_chunked_dma_kernel(rows_per_step):
    # One contiguous row-chunk DMA per grid step.  Chunks are disjoint, so the
    # grid axis is safely "parallel" (sharded across the two v7x TensorCores;
    # a plain sequential loop on single-TC v5e/v6e).
    def kernel(x_ref, o_ref, sem):
        start = pl.program_id(0) * rows_per_step
        cp = pltpu.make_async_copy(
            x_ref.at[pl.ds(start, rows_per_step)],
            o_ref.at[pl.ds(start, rows_per_step)],
            sem,
        )
        cp.start()
        cp.wait()

    return kernel


def _alias_noop_kernel(x_ref, o_ref):
    # Donate path: the output buffer IS the input buffer (input_output_aliases)
    # and the row-major data is already correct, so there is nothing to move.
    # Touch pins the read->write dependency so the aliased output materializes.
    pltpu.touch(o_ref)


# ----------------------------------------------------------------------------
# Tiling helpers
# ----------------------------------------------------------------------------
def _lane_dense_factorization(total):
    """Factor `total` elements into (rows, cols) with cols a multiple of 128
    when possible.  For a row-major identity copy ANY factorization is valid,
    so tiling is fully decoupled from the batch dimension.  If no 128-multiple
    divisor exists we fall back to a single row — still just one contiguous
    HBM->HBM DMA, so (unlike a VMEM-staged copy) there is no VMEM-size hazard.
    """
    cols = (min(total, 8192) // 128) * 128
    while cols >= 128:
        if total % cols == 0:
            return total // cols, cols
        cols -= 128
    return 1, total


def _num_dma_steps(rows, row_bytes, max_steps=8, min_chunk_bytes=4 << 20):
    """Largest step count <= max_steps whose chunks evenly divide `rows` and
    are each >= min_chunk_bytes.  Multiple DMAs only pay off for large copies
    (overlapping DMA queues / dual-TC issue on v7x); small copies use 1."""
    for d in range(min(max_steps, rows), 1, -1):
        if rows % d == 0 and (rows // d) * row_bytes >= min_chunk_bytes:
            return d
    return 1


# ----------------------------------------------------------------------------
# Wrapper (Unflatten.forward)
# ----------------------------------------------------------------------------
def unflatten(x, channel, height, width, *, donate=False):
    """Pallas equivalent of Unflatten(channel, height, width).forward(x)."""
    B = x.shape[0]
    N = channel * height * width
    total = B * N
    assert math.prod(x.shape) == total, "element count mismatch for view()"

    dtype = x.dtype
    itemsize = jnp.dtype(dtype).itemsize

    if donate:
        # True zero-copy: output aliases the donated input buffer and the body
        # is empty (touch only) -> 0 bytes of HBM traffic.  Only meaningful
        # when the caller can actually donate x (e.g. under jit, no other
        # users of x).
        flat = pl.pallas_call(
            _alias_noop_kernel,
            out_shape=jax.ShapeDtypeStruct((B, N), dtype),
            in_specs=[pl.BlockSpec(memory_space=pl.ANY)],
            out_specs=pl.BlockSpec(memory_space=pl.ANY),
            input_output_aliases={0: 0},
        )(x.reshape(B, N))
        return flat.reshape(B, channel, height, width)

    # Row-major reinterpretation is free; pick a lane-dense 2-D view that is
    # independent of B (so tiny batches don't degenerate into tiny chunks).
    rows, cols = _lane_dense_factorization(total)
    x_2d = x.reshape(rows, cols)
    n_steps = _num_dma_steps(rows, cols * itemsize)

    # Pure-bandwidth op: tell XLA so it can overlap the call with neighbors.
    cost = pl.CostEstimate(
        flops=0, transcendentals=0, bytes_accessed=2 * total * itemsize
    )

    if n_steps == 1:
        flat = pl.pallas_call(
            _single_dma_kernel,
            out_shape=jax.ShapeDtypeStruct((rows, cols), dtype),
            in_specs=[pl.BlockSpec(memory_space=pl.ANY)],
            out_specs=pl.BlockSpec(memory_space=pl.ANY),
            scratch_shapes=[pltpu.SemaphoreType.DMA(())],
            cost_estimate=cost,
        )(x_2d)
    else:
        rows_per_step = rows // n_steps
        flat = pl.pallas_call(
            _make_chunked_dma_kernel(rows_per_step),
            out_shape=jax.ShapeDtypeStruct((rows, cols), dtype),
            grid=(n_steps,),
            in_specs=[pl.BlockSpec(memory_space=pl.ANY)],
            out_specs=pl.BlockSpec(memory_space=pl.ANY),
            scratch_shapes=[pltpu.SemaphoreType.DMA(())],
            compiler_params=pltpu.CompilerParams(
                dimension_semantics=("parallel",)
            ),
            cost_estimate=cost,
        )(x_2d)

    # The unflatten itself is metadata-only; do it outside the kernel.
    return flat.reshape(B, channel, height, width)


if __name__ == "__main__":
    # Module is parameter-free; nothing to initialize.
    B, C, H, W = 2, 4, 16, 16
    key = jax.random.PRNGKey(0)
    x = jax.random.normal(key, (B, C * H * W), dtype=jnp.float32)

    out = unflatten(x, C, H, W)
    out = jax.block_until_ready(out)

    ref = x.reshape(B, C, H, W)  # reference semantics of torch .view
    assert out.shape == (B, C, H, W), out.shape
    assert out.dtype == x.dtype
    assert bool(jnp.array_equal(out, ref)), "kernel output mismatch vs reshape reference"

    print("KERNEL_OK")
</pallas_src>

<mosaic_0001>
module attributes {stable_mosaic.version = 11 : i64} {
  func.func @_single_dma_kernel(%arg0: memref<1x2048xf32, #tpu.memory_space<any>>, %arg1: memref<1x2048xf32, #tpu.memory_space<any>>, %arg2: memref<!tpu.dma_semaphore, #tpu.memory_space<semaphore_mem>>) attributes {dimension_semantics = [], scalar_prefetch = 0 : i64, scratch_operands = 1 : i64, tpu.core_type = #tpu.core_type<tc>} {
    tpu.enqueue_dma source(%arg0 : memref<1x2048xf32, #tpu.memory_space<any>>) target(%arg1 : memref<1x2048xf32, #tpu.memory_space<any>>) target_semaphore(%arg2 : memref<!tpu.dma_semaphore, #tpu.memory_space<semaphore_mem>>)
    tpu.wait_dma2 semaphore(%arg2 : memref<!tpu.dma_semaphore, #tpu.memory_space<semaphore_mem>>) src(%arg0 : memref<1x2048xf32, #tpu.memory_space<any>>) dst(%arg1 : memref<1x2048xf32, #tpu.memory_space<any>>)
    return
  }
}

</mosaic_0001>

<bundles_post_ra>
// kernel: tpu_custom_call.1
= control target key start
LH: loop header
LB: loop body
LE: loop exit
PB: predicated region body
PF: predicated region fallthrough
CT: control target
= control target key end

     0   :  { %s32_s12 = smov [#allocation2]   ;;  %s33_s13 = smov [#allocation3]   ;;  %s51_s0 = inlined_call_operand.hbm [shape: f32[1,2048], index: 0, kind: input, shape index: {}]   ;;  %s52_s1 = inlined_call_operand.hbm [shape: f32[1,2048], index: 1, kind: output, shape index: {}]  }
   0x1   :  { %s10_s8 = sshll.u32 %s51_s0, 4  ;;  %s12_s11 = sshll.u32 %s52_s1, 4  ;;  %s11_s8 = int_to_ptr.hbm [resolvable:$true] %s10_s8  ;;  %s13_s11 = int_to_ptr.hbm [resolvable:$true] %s12_s11 }
   0x2   :  { %s34_s14 = smov 0  }
   0x3   :  { %16 = dma.general %s11_s8, 256, %s13_s11, %s32_s12, %s33_s13, [#allocation4], %s34_s14, 0  }
   0x4   :  { %30 = dma.done.wait [#allocation2], 256 }
   0x5   :  { %31 = vsyncadd [#allocation2], 4294967040 }
   0x6   :  { %20 = vsyncmov [#allocation2] }
   0x9   :  { %s21_s15 = vpop.sfrf %20 }
   0xa   :  { %p26_p0 = scmp.ne.s32.totalorder %s21_s15, 0 }
   0xc   :  { %25 = shalt.err (%p26_p0)  }

</bundles_post_ra>
